<compile_context>
chip_gen: v7x
topology: tpu7x:2x2x1
jax: 0.10.0
libtpu: 0.0.40
codegen_flags: <defaults>
</compile_context>

<pallas_src>
import jax
import jax.numpy as jnp
from jax import lax
from jax.experimental import pallas as pl
from jax.experimental.pallas import tpu as pltpu


def _make_value_mlp_kernel(n_parts):
    """Build the fused MLP kernel for a state made of `n_parts` feature chunks."""

    def kernel(*refs):
        xs = refs[:n_parts]
        w1s = refs[n_parts:2 * n_parts]
        b1_ref, w2_ref, b2_ref, w3_ref, b3_ref, o_ref = refs[2 * n_parts:]

        # ---- Layer 1: concat fused as a sum of partial matmuls (MXU) ----
        h = jnp.dot(xs[0][...].astype(w1s[0].dtype), w1s[0][...],
                    preferred_element_type=jnp.float32)
        for p in range(1, n_parts):
            h = h + jnp.dot(xs[p][...].astype(w1s[p].dtype), w1s[p][...],
                            preferred_element_type=jnp.float32)
        h = jnp.maximum(h + b1_ref[...], 0.0)        # bias + ReLU in f32 (VPU)

        # ---- Layer 2 (MXU) ----
        h = jnp.dot(h.astype(w2_ref.dtype), w2_ref[...],
                    preferred_element_type=jnp.float32)
        h = jnp.maximum(h + b2_ref[...], 0.0)

        # ---- Layer 3: VPU mul + lane reduce (XLU); no N=1 MXU pass ----
        v = jnp.sum(h * w3_ref[...], axis=-1, keepdims=True) + b3_ref[0]
        o_ref[...] = v.astype(o_ref.dtype)

    return kernel


def value_network_forward(state, params, *, block_b=512, interpret=False):
    """state: list/tuple of [B, f_i] arrays (equivalent to torch.cat(state, 1)).
    params: dict with w1 (num_inputs,h0), b1 (1,h0), w2 (h0,h1), b2 (1,h1),
            w3 (1,h1) row, b3 (1,) scalar.  Returns (value [B,1] f32, None)."""
    state = list(state)
    n_parts = len(state)
    B = state[0].shape[0]
    part_widths = [s.shape[1] for s in state]

    w1, b1 = params["w1"], params["b1"]
    w2, b2 = params["w2"], params["b2"]
    w3, b3 = params["w3"], params["b3"]
    num_inputs, h0 = w1.shape
    h1 = w2.shape[1]
    assert sum(part_widths) == num_inputs

    # Split the first-layer weight row-wise (tiny, static slices) so the
    # concatenated state never needs to be materialized in HBM.
    w1_parts, off = [], 0
    for f in part_widths:
        w1_parts.append(lax.slice_in_dim(w1, off, off + f, axis=0))
        off += f

    # Batch tile: as large as practical (>=512 amortizes per-step overhead),
    # multiple of 8 for sublane alignment; odd small batches use a full block.
    if B % 8 == 0:
        tb = min(block_b, B)
    else:
        tb = B  # full-dim exception of the (8,128) rule
    grid = (pl.cdiv(B, tb),)

    x_specs = [pl.BlockSpec((tb, f), lambda i: (i, 0)) for f in part_widths]
    resident = lambda shape: pl.BlockSpec(shape, lambda i: (0, 0))  # VMEM-resident
    in_specs = (
        x_specs
        + [resident(wp.shape) for wp in w1_parts]
        + [resident(b1.shape), resident(w2.shape), resident(b2.shape),
           resident(w3.shape)]
        + [pl.BlockSpec(memory_space=pltpu.MemorySpace.SMEM)]   # b3 scalar
    )
    out_spec = pl.BlockSpec((tb, 1), lambda i: (i, 0))

    flops = 2 * B * (num_inputs * h0 + h0 * h1 + h1)
    bytes_accessed = (
        sum(s.size * s.dtype.itemsize for s in state)
        + sum(a.size * a.dtype.itemsize for a in (w1, b1, w2, b2, w3, b3))
        + B * 4
    )

    out = pl.pallas_call(
        _make_value_mlp_kernel(n_parts),
        out_shape=jax.ShapeDtypeStruct((B, 1), jnp.float32),
        grid=grid,
        in_specs=in_specs,
        out_specs=out_spec,
        compiler_params=pltpu.CompilerParams(
            dimension_semantics=("parallel",)),
        cost_estimate=pl.CostEstimate(
            flops=flops, transcendentals=0, bytes_accessed=bytes_accessed),
        interpret=interpret,
    )(*state, *w1_parts, b1, w2, b2, w3, b3)
    return out, None  # matches PyTorch: return (x, None)


def xavier_uniform(key, fan_in, fan_out, dtype=jnp.float32):
    # torch.nn.init.xavier_uniform_ (gain=1); generated in (in, out) layout.
    bound = (6.0 / (fan_in + fan_out)) ** 0.5
    w = jax.random.uniform(key, (fan_in, fan_out), jnp.float32,
                           minval=-bound, maxval=bound)
    return w.astype(dtype)


def init_value_network_params(key, num_inputs, hidden_sizes,
                              param_dtype=jnp.bfloat16):
    """Matmul weights in `param_dtype` (bf16 is MXU-native on v5e/v6e/v7x);
    biases and the value-head row stay f32 so elementwise math is f32."""
    k1, k2, k3 = jax.random.split(key, 3)
    h0, h1 = hidden_sizes
    return {
        "w1": xavier_uniform(k1, num_inputs, h0, param_dtype),
        "b1": jnp.zeros((1, h0), jnp.float32),
        "w2": xavier_uniform(k2, h0, h1, param_dtype),
        "b2": jnp.zeros((1, h1), jnp.float32),
        # w3 stored as a (1, h1) row: last layer is a VPU mul + lane reduce.
        "w3": xavier_uniform(k3, h1, 1, jnp.float32).reshape(1, h1),
        "b3": jnp.zeros((1,), jnp.float32),
    }


def value_network_reference(state, params):
    """Pure-JAX reference of the same math (same dtypes as the kernel)."""
    x = jnp.concatenate(state, axis=1)
    w1, b1 = params["w1"], params["b1"]
    w2, b2 = params["w2"], params["b2"]
    w3, b3 = params["w3"], params["b3"]
    h = jnp.dot(x.astype(w1.dtype), w1, preferred_element_type=jnp.float32) + b1
    h = jnp.maximum(h, 0.0)
    h = jnp.dot(h.astype(w2.dtype), w2, preferred_element_type=jnp.float32) + b2
    h = jnp.maximum(h, 0.0)
    return jnp.sum(h * w3, axis=-1, keepdims=True) + b3[0]


if __name__ == "__main__":
    key = jax.random.PRNGKey(0)
    k_s1, k_s2, k_p, k_b = jax.random.split(key, 4)

    # Small shapes: batch=8, state is a 2-part observation (16 + 16 = 32 inputs),
    # hidden_sizes = [32, 32].
    B = 8
    hidden_sizes = [32, 32]
    state = [
        jax.random.normal(k_s1, (B, 16), jnp.float32),
        jax.random.normal(k_s2, (B, 16), jnp.float32),
    ]
    num_inputs = sum(s.shape[1] for s in state)

    ok = True
    for param_dtype, tol in ((jnp.float32, 1e-5), (jnp.bfloat16, 2e-2)):
        params = init_value_network_params(k_p, num_inputs, hidden_sizes,
                                           param_dtype=param_dtype)
        # PyTorch init zeroes the biases; perturb them here so the bias path is
        # actually exercised by the cross-check.
        kb1, kb2, kb3 = jax.random.split(k_b, 3)
        params["b1"] = 0.1 * jax.random.normal(kb1, params["b1"].shape, jnp.float32)
        params["b2"] = 0.1 * jax.random.normal(kb2, params["b2"].shape, jnp.float32)
        params["b3"] = 0.1 * jax.random.normal(kb3, params["b3"].shape, jnp.float32)

        value, extra = value_network_forward(state, params)
        value = jax.block_until_ready(value)
        ref = value_network_reference(state, params)

        assert value.shape == (B, 1)
        assert extra is None
        ok &= bool(jnp.allclose(value, ref, atol=tol, rtol=tol))

    assert ok
    print("KERNEL_OK")
</pallas_src>

<mosaic_0001>
module attributes {stable_mosaic.version = 11 : i64} {
  func.func @kernel(%arg0: i32, %arg1: memref<8x16xf32, #tpu.memory_space<vmem>>, %arg2: memref<8x16xf32, #tpu.memory_space<vmem>>, %arg3: memref<16x32xf32, #tpu.memory_space<vmem>>, %arg4: memref<16x32xf32, #tpu.memory_space<vmem>>, %arg5: memref<1x32xf32, #tpu.memory_space<vmem>>, %arg6: memref<32x32xf32, #tpu.memory_space<vmem>>, %arg7: memref<1x32xf32, #tpu.memory_space<vmem>>, %arg8: memref<1x32xf32, #tpu.memory_space<vmem>>, %arg9: memref<1xf32, #tpu.memory_space<smem>>, %arg10: memref<8x1xf32, #tpu.memory_space<vmem>>) attributes {dimension_semantics = [#tpu.dimension_semantics<parallel>], iteration_bounds = array<i64: 1>, scalar_prefetch = 0 : i64, scratch_operands = 0 : i64, tpu.core_type = #tpu.core_type<tc>, window_params = [{transform_indices = @transform_0, window_bounds = array<i64: 8, 16>}, {transform_indices = @transform_1, window_bounds = array<i64: 8, 16>}, {pipeline_mode = #tpu.pipeline_mode<synchronous>, transform_indices = @transform_2, window_bounds = array<i64: 16, 32>}, {pipeline_mode = #tpu.pipeline_mode<synchronous>, transform_indices = @transform_3, window_bounds = array<i64: 16, 32>}, {pipeline_mode = #tpu.pipeline_mode<synchronous>, transform_indices = @transform_4, window_bounds = array<i64: 1, 32>}, {pipeline_mode = #tpu.pipeline_mode<synchronous>, transform_indices = @transform_5, window_bounds = array<i64: 32, 32>}, {pipeline_mode = #tpu.pipeline_mode<synchronous>, transform_indices = @transform_6, window_bounds = array<i64: 1, 32>}, {pipeline_mode = #tpu.pipeline_mode<synchronous>, transform_indices = @transform_7, window_bounds = array<i64: 1, 32>}, {transform_indices = @transform_8, window_bounds = array<i64: 1>}, {transform_indices = @transform_9, window_bounds = array<i64: 8, 1>}]} {
    %c0 = arith.constant 0 : index
    %c0_0 = arith.constant 0 : index
    %0 = vector.load %arg1[%c0, %c0_0] : memref<8x16xf32, #tpu.memory_space<vmem>>, vector<8x16xf32>
    %c0_1 = arith.constant 0 : index
    %c0_2 = arith.constant 0 : index
    %1 = vector.load %arg3[%c0_1, %c0_2] : memref<16x32xf32, #tpu.memory_space<vmem>>, vector<16x32xf32>
    %cst = arith.constant dense<0.000000e+00> : vector<8x32xf32>
    %2 = tpu.matmul %0, %1, %cst {dimension_numbers = #tpu.dot_dimension_numbers<[1], [0], [0], [1], [0, 0, 1, 1], [], []>} : vector<8x16xf32>, vector<16x32xf32>, vector<8x32xf32> -> vector<8x32xf32>
    %c0_3 = arith.constant 0 : index
    %c0_4 = arith.constant 0 : index
    %3 = vector.load %arg2[%c0_3, %c0_4] : memref<8x16xf32, #tpu.memory_space<vmem>>, vector<8x16xf32>
    %c0_5 = arith.constant 0 : index
    %c0_6 = arith.constant 0 : index
    %4 = vector.load %arg4[%c0_5, %c0_6] : memref<16x32xf32, #tpu.memory_space<vmem>>, vector<16x32xf32>
    %cst_7 = arith.constant dense<0.000000e+00> : vector<8x32xf32>
    %5 = tpu.matmul %3, %4, %cst_7 {dimension_numbers = #tpu.dot_dimension_numbers<[1], [0], [0], [1], [0, 0, 1, 1], [], []>} : vector<8x16xf32>, vector<16x32xf32>, vector<8x32xf32> -> vector<8x32xf32>
    %6 = arith.addf %2, %5 : vector<8x32xf32>
    %c0_8 = arith.constant 0 : index
    %c0_9 = arith.constant 0 : index
    %7 = vector.load %arg5[%c0_8, %c0_9] : memref<1x32xf32, #tpu.memory_space<vmem>>, vector<1x32xf32>
    %8 = vector.broadcast %7 : vector<1x32xf32> to vector<8x32xf32>
    %9 = arith.addf %6, %8 : vector<8x32xf32>
    %cst_10 = arith.constant 0.000000e+00 : f32
    %10 = vector.broadcast %cst_10 : f32 to vector<8x32xf32>
    %11 = arith.maximumf %9, %10 : vector<8x32xf32>
    %c0_11 = arith.constant 0 : index
    %c0_12 = arith.constant 0 : index
    %12 = vector.load %arg6[%c0_11, %c0_12] : memref<32x32xf32, #tpu.memory_space<vmem>>, vector<32x32xf32>
    %cst_13 = arith.constant dense<0.000000e+00> : vector<8x32xf32>
    %13 = tpu.matmul %11, %12, %cst_13 {dimension_numbers = #tpu.dot_dimension_numbers<[1], [0], [0], [1], [0, 0, 1, 1], [], []>} : vector<8x32xf32>, vector<32x32xf32>, vector<8x32xf32> -> vector<8x32xf32>
    %c0_14 = arith.constant 0 : index
    %c0_15 = arith.constant 0 : index
    %14 = vector.load %arg7[%c0_14, %c0_15] : memref<1x32xf32, #tpu.memory_space<vmem>>, vector<1x32xf32>
    %15 = vector.broadcast %14 : vector<1x32xf32> to vector<8x32xf32>
    %16 = arith.addf %13, %15 : vector<8x32xf32>
    %cst_16 = arith.constant 0.000000e+00 : f32
    %17 = vector.broadcast %cst_16 : f32 to vector<8x32xf32>
    %18 = arith.maximumf %16, %17 : vector<8x32xf32>
    %c0_17 = arith.constant 0 : index
    %c0_18 = arith.constant 0 : index
    %19 = vector.load %arg8[%c0_17, %c0_18] : memref<1x32xf32, #tpu.memory_space<vmem>>, vector<1x32xf32>
    %20 = vector.broadcast %19 : vector<1x32xf32> to vector<8x32xf32>
    %21 = arith.mulf %18, %20 : vector<8x32xf32>
    %cst_19 = arith.constant dense<0.000000e+00> : vector<8xf32>
    %22 = vector.multi_reduction <add>, %21, %cst_19 [1] : vector<8x32xf32> to vector<8xf32>
    %23 = vector.shape_cast %22 : vector<8xf32> to vector<8x1xf32>
    %c0_20 = arith.constant 0 : index
    %24 = memref.load %arg9[%c0_20] : memref<1xf32, #tpu.memory_space<smem>>
    %25 = vector.broadcast %24 : f32 to vector<8x1xf32>
    %26 = arith.addf %23, %25 : vector<8x1xf32>
    %c0_21 = arith.constant 0 : index
    %c0_22 = arith.constant 0 : index
    %27 = vector.load %arg10[%c0_21, %c0_22] : memref<8x1xf32, #tpu.memory_space<vmem>>, vector<8x1xf32>
    tpu.vector_store %arg10[%c0_21, %c0_22], %26 {strides = array<i32>} : memref<8x1xf32, #tpu.memory_space<vmem>>, vector<8x1xf32>,
    return
  }
  func.func @transform_0(%arg0: i32) -> (i32, i32) {
    %c0_i32 = arith.constant 0 : i32
    %c0_i32_0 = arith.constant 0 : i32
    return %arg0, %c0_i32 : i32, i32
  }
  func.func @transform_1(%arg0: i32) -> (i32, i32) {
    %c0_i32 = arith.constant 0 : i32
    %c0_i32_0 = arith.constant 0 : i32
    return %arg0, %c0_i32 : i32, i32
  }
  func.func @transform_2(%arg0: i32) -> (i32, i32) {
    %c0_i32 = arith.constant 0 : i32
    %c0_i32_0 = arith.constant 0 : i32
    %c0_i32_1 = arith.constant 0 : i32
    return %c0_i32, %c0_i32_0 : i32, i32
  }
  func.func @transform_3(%arg0: i32) -> (i32, i32) {
    %c0_i32 = arith.constant 0 : i32
    %c0_i32_0 = arith.constant 0 : i32
    %c0_i32_1 = arith.constant 0 : i32
    return %c0_i32, %c0_i32_0 : i32, i32
  }
  func.func @transform_4(%arg0: i32) -> (i32, i32) {
    %c0_i32 = arith.constant 0 : i32
    %c0_i32_0 = arith.constant 0 : i32
    %c0_i32_1 = arith.constant 0 : i32
    return %c0_i32, %c0_i32_0 : i32, i32
  }
  func.func @transform_5(%arg0: i32) -> (i32, i32) {
    %c0_i32 = arith.constant 0 : i32
    %c0_i32_0 = arith.constant 0 : i32
    %c0_i32_1 = arith.constant 0 : i32
    return %c0_i32, %c0_i32_0 : i32, i32
  }
  func.func @transform_6(%arg0: i32) -> (i32, i32) {
    %c0_i32 = arith.constant 0 : i32
    %c0_i32_0 = arith.constant 0 : i32
    %c0_i32_1 = arith.constant 0 : i32
    return %c0_i32, %c0_i32_0 : i32, i32
  }
  func.func @transform_7(%arg0: i32) -> (i32, i32) {
    %c0_i32 = arith.constant 0 : i32
    %c0_i32_0 = arith.constant 0 : i32
    %c0_i32_1 = arith.constant 0 : i32
    return %c0_i32, %c0_i32_0 : i32, i32
  }
  func.func @transform_8(%arg0: i32) -> i32 {
    %c0_i32 = arith.constant 0 : i32
    %c0_i32_0 = arith.constant 0 : i32
    return %c0_i32 : i32
  }
  func.func @transform_9(%arg0: i32) -> (i32, i32) {
    %c0_i32 = arith.constant 0 : i32
    %c0_i32_0 = arith.constant 0 : i32
    return %arg0, %c0_i32 : i32, i32
  }
}

</mosaic_0001>

<bundles_post_ra>
// kernel: tpu_custom_call.1
= control target key start
LH: loop header
LB: loop body
LE: loop exit
PB: predicated region body
PF: predicated region fallthrough
CT: control target
= control target key end

     0   :  { %15 = vsyncpa [#allocation4], 0  ;;  %s695_s0 = inlined_call_operand.hbm [shape: f32[8,16], index: 0, kind: input, shape index: {}]   ;;  %s696_s1 = inlined_call_operand.hbm [shape: f32[8,16], index: 1, kind: input, shape index: {}]   ;;  %s697_s2 = inlined_call_operand.hbm [shape: f32[16,32], index: 2, kind: input, shape index: {}]   ;;  %s698_s3 = inlined_call_operand.hbm [shape: f32[16,32], index: 3, kind: input, shape index: {}]   ;;  %s699_s4 = inlined_call_operand.vmem [shape: f32[1,32], index: 4, kind: input, shape index: {}]   ;;  %s700_s5 = inlined_call_operand.hbm [shape: f32[32,32], index: 5, kind: input, shape index: {}]   ;;  %s701_s6 = inlined_call_operand.vmem [shape: f32[1,32], index: 6, kind: input, shape index: {}]   ;;  %s702_s7 = inlined_call_operand.vmem [shape: f32[1,32], index: 7, kind: input, shape index: {}]   ;;  %s703_s8 = inlined_call_operand.<no memory space> [shape: f32[1], index: 8, kind: input, shape index: {}]   ;;  %s704_s9 = inlined_call_operand.vmem [shape: f32[8,1], index: 9, kind: output, shape index: {}]  }
   0x1   :  { %16 = vsyncpa [#allocation6], 0 }
   0x2   :  { %17 = vsyncpa [#allocation9], 0  ;;  %s548_s30 = smov [#allocation5]   ;;  %s432_s13 = scalar_lea.hbm %s696_s1, 128 }
   0x3   :  { %s34_s10 = sshll.u32 %s548_s30, 4  ;;  %p433_p0 = scmp.ne.s32.totalorder %s696_s1, %s432_s13  ;;  %s35_s10 = int_to_ptr.vmem [resolvable:$true] %s34_s10 }
   0x4   :  { %p436_p1 = scmp.lt.u32.totalorder %s432_s13, %s696_s1 }
   0x6   :  { %p438_p2 = pnand %p436_p1, %p433_p0 }
   0x8   :  { %441 = shalt.err (!%p438_p2)
}
   0x9   :  { %s442_s18 = scalar_lea.vmem %s35_s10, 128  ;;  %p447_p4 = scmp.lt.s32.totalorder %s35_s10, %s35_s10 }
   0xa   :  { %p443_p3 = scmp.ne.s32.totalorder %s35_s10, %s442_s18  ;;  %p448_p5 = scmp.lt.s32.totalorder %s442_s18, %s442_s18 }
   0xc   :  { %p449_p6 = por %p448_p5, %p447_p4 }
   0xe   :  { %p450_p7 = pnand %p449_p6, %p443_p3 }
  0x10   :  { %453 = shalt.err (!%p450_p7)
}
  0x11   :  { %37 = dma.hbm_to_vmem [thread:$0]  %s696_s1, 128, %s35_s10, [#allocation6]  }
  0x12   :  { %s549_s21 = smov [#allocation8]   ;;  %s550_s23 = smov [#allocation3]  }
  0x13   :  { %s55_s22 = sshll.u32 %s549_s21, 4  ;;  %s24_s24 = sshll.u32 %s550_s23, 4  ;;  %s56_s22 = int_to_ptr.vmem [resolvable:$true] %s55_s22  ;;  %s25_s24 = int_to_ptr.vmem [resolvable:$true] %s24_s24 }
  0x14   :  { %s454_s27 = scalar_lea.hbm %s698_s3, 256 }
  0x15   :  { %p455_p8 = scmp.ne.s32.totalorder %s698_s3, %s454_s27  ;;  %p458_p9 = scmp.lt.u32.totalorder %s454_s27, %s698_s3 }
  0x17   :  { %p460_p10 = pnand %p458_p9, %p455_p8 }
  0x19   :  { %463 = shalt.err (!%p460_p10)
}
  0x1a   :  { %s464_s1 = scalar_lea.vmem %s56_s22, 256  ;;  %p469_p12 = scmp.lt.s32.totalorder %s56_s22, %s56_s22 }
  0x1b   :  { %p465_p11 = scmp.ne.s32.totalorder %s56_s22, %s464_s1  ;;  %p470_p13 = scmp.lt.s32.totalorder %s464_s1, %s464_s1 }
  0x1d   :  { %p471_p0 = por %p470_p13, %p469_p12 }
  0x1f   :  { %p472_p1 = pnand %p471_p0, %p465_p11 }
  0x21   :  { %475 = shalt.err (!%p472_p1)
}
  0x22   :  { %s551_s10 = smov 128   ;;  %s552_s12 = smov 8  }
  0x23   :  { %61 = dma.hbm_to_vmem [thread:$0]  %s698_s3, 256, %s56_s22, [#allocation9], %s551_s10, %s551_s10, %s552_s12  }
  0x24   :  { %s476_s17 = scalar_lea.hbm %s695_s0, 128 }
  0x25   :  { %p477_p2 = scmp.ne.s32.totalorder %s695_s0, %s476_s17  ;;  %p480_p3 = scmp.lt.u32.totalorder %s476_s17, %s695_s0 }
  0x27   :  { %p482_p4 = pnand %p480_p3, %p477_p2 }
  0x29   :  { %485 = shalt.err (!%p482_p4)
}
  0x2a   :  { %s486_s23 = scalar_lea.vmem %s25_s24, 128  ;;  %p491_p6 = scmp.lt.s32.totalorder %s25_s24, %s25_s24 }
  0x2b   :  { %p487_p5 = scmp.ne.s32.totalorder %s25_s24, %s486_s23  ;;  %p492_p7 = scmp.lt.s32.totalorder %s486_s23, %s486_s23 }
  0x2d   :  { %p493_p8 = por %p492_p7, %p491_p6 }
  0x2f   :  { %p494_p9 = pnand %p493_p8, %p487_p5 }
  0x31   :  { %497 = shalt.err (!%p494_p9)
}
  0x32   :  { %27 = dma.hbm_to_vmem [thread:$0]  %s695_s0, 128, %s25_s24, [#allocation4]  }
  0x33   :  { %s553_s25 = smov [#allocation7]   ;;  %s554_s27 = smov [#allocation10]  }
  0x34   :  { %s43_s26 = sshll.u32 %s553_s25, 4  ;;  %s69_s28 = sshll.u32 %s554_s27, 4  ;;  %s44_s26 = int_to_ptr.vmem [resolvable:$true] %s43_s26  ;;  %s70_s28 = int_to_ptr.vmem [resolvable:$true] %s69_s28 }
  0x35   :  { %s498_s11 = scalar_lea.hbm %s697_s2, 256 }
  0x36   :  { %p499_p10 = scmp.ne.s32.totalorder %s697_s2, %s498_s11  ;;  %p502_p11 = scmp.lt.u32.totalorder %s498_s11, %s697_s2 }
  0x38   :  { %p504_p12 = pnand %p502_p11, %p499_p10 }
  0x3a   :  { %507 = shalt.err (!%p504_p12)
}
  0x3b   :  { %s508_s0 = scalar_lea.vmem %s44_s26, 256  ;;  %p513_p0 = scmp.lt.s32.totalorder %s44_s26, %s44_s26 }
  0x3c   :  { %p509_p13 = scmp.ne.s32.totalorder %s44_s26, %s508_s0  ;;  %p514_p1 = scmp.lt.s32.totalorder %s508_s0, %s508_s0 }
  0x3e   :  { %p515_p2 = por %p514_p1, %p513_p0 }
  0x40   :  { %p516_p3 = pnand %p515_p2, %p509_p13 }
  0x42   :  { %519 = shalt.err (!%p516_p3)
}
  0x43   :  { %49 = dma.hbm_to_vmem [thread:$0]  %s697_s2, 256, %s44_s26, [#allocation6], %s551_s10, %s551_s10, %s552_s12  }
  0x44   :  { %s520_s19 = scalar_lea.hbm %s700_s5, 512 }
  0x45   :  { %p521_p4 = scmp.ne.s32.totalorder %s700_s5, %s520_s19  ;;  %p524_p5 = scmp.lt.u32.totalorder %s520_s19, %s700_s5 }
  0x47   :  { %p526_p6 = pnand %p524_p5, %p521_p4 }
  0x49   :  { %529 = shalt.err (!%p526_p6)
}
  0x4a   :  { %s530_s22 = scalar_lea.vmem %s70_s28, 512  ;;  %p535_p8 = scmp.lt.s32.totalorder %s70_s28, %s70_s28 }
  0x4b   :  { %p531_p7 = scmp.ne.s32.totalorder %s70_s28, %s530_s22  ;;  %p536_p9 = scmp.lt.s32.totalorder %s530_s22, %s530_s22 }
  0x4d   :  { %p537_p10 = por %p536_p9, %p535_p8 }
  0x4f   :  { %p538_p11 = pnand %p537_p10, %p531_p7 }
  0x51   :  { %541 = shalt.err (!%p538_p11)
}
  0x52   :  { %75 = dma.hbm_to_vmem [thread:$0]  %s700_s5, 512, %s70_s28, [#allocation9], %s551_s10, %s551_s10, %s552_s12  }
  0x53   :  { %542 = dma.done.wait [#allocation4], 128  }
  0x54   :  { %543 = vsyncadd [#allocation4], 4294967168 }
  0x55   :  { %544 = dma.done.wait [#allocation6], 384  }
  0x56   :  { %545 = vsyncadd [#allocation6], 4294966912 }
  0x57   :  { %546 = dma.done.wait [#allocation9], 768  }
  0x58   :  { %547 = vsyncadd [#allocation9], 4294966528  ;;  %v555_v0 = vmov 0.0|0.0   ;;  %vm556_vm0 = vmmov 0   ;;  %v557_v1 = vmov 0.0   ;;  %v101_v2 = vld [vmem:[#allocation8] sm:$0xff]  ;;  %v357_v32 = vstv %s703_s8 }
  0x59   :  { %410 = vmatprep.subr.bf16.mxu1 %v555_v0  ;;  %389 = vmatprep.mubr.msk.f32.mxu1 %vm556_vm0, %v557_v1  ;;  %v102_v3 = vld [vmem:[#allocation8 + $0x8] sm:$0xff]  ;;  %v98_v5 = vld [vmem:[#allocation7] sm:$0xff]  ;;  %v99_v6 = vld [vmem:[#allocation7 + $0x8] sm:$0xff]  ;;  %vm103_vm1 = vcmask 130048   ;;  %vm270_vm2 = vcmask 261120   ;;  %vm359_vm3 = vcmask 7168  }
  0x5a   :  { %416 = vmatprep.subr.bf16.mxu0 %v555_v0  ;;  %407 = vmatprep.mubr.msk.f32.mxu0 %vm556_vm0, %v557_v1  ;;  %v411_v4 = vpack.c.bf16 %v102_v3, %v101_v2  ;;  %v100_v7 = vld [vmem:[#allocation5] sm:$0xff]  ;;  %v414_v8 = vpack.c.bf16 %v99_v6, %v98_v5  ;;  %v97_v9 = vld [vmem:[#allocation3] sm:$0xff]  ;;  %v259_v10 = vld [vmem:[#allocation10] sm:$0xff] }
  0x5b   :  { %v260_v11 = vld [vmem:[#allocation10 + $0x8] sm:$0xff]  ;;  %v261_v13 = vld [vmem:[#allocation10 + $0x10] sm:$0xff]  ;;  %v262_v14 = vld [vmem:[#allocation10 + $0x18] sm:$0xff] }
  0x5c   :  { %412 = vmatpush3.bf16.msra.mxu1 %v411_v4  ;;  %v417_v12 = vpack.c.bf16 %v260_v11, %v259_v10  ;;  %v420_v15 = vpack.c.bf16 %v262_v14, %v261_v13  ;;  %v370_v19 = vld [vmem:[%s699_s4] ss:$0 sm:$0xff] }
  0x5d   :  { %413 = vmatprep.subr.bf16.mxu1 %v555_v0  ;;  %v371_v24 = vld [vmem:[%s701_s6] ss:$0 sm:$0xff] }
  0x5e   :  { %418 = vmatpush3.bf16.msra.mxu0 %v417_v12  ;;  %v373_v28 = vld [vmem:[%s702_s7] ss:$0 sm:$0xff] }
  0x5f   :  { %390 = vmatmul.mubr.msk.f32.vlgmr.msra.gmra.mrb[0].mxu1 %vm103_vm1, %v100_v7  ;;  %419 = vmatprep.subr.bf16.mxu0 %v555_v0 }
  0x60   :  { %415 = vmatpush3.bf16.msra.mxu1 %v414_v8  ;;  %396 = vmatprep.mubr.msk.f32.mxu1 %vm556_vm0, %v557_v1 }
  0x62   :  { %421 = vmatpush3.bf16.msra.mxu0 %v420_v15 }
  0x63   :  { %397 = vmatmul.mubr.msk.f32.vlgmr.msra.gmra.mrb[2].mxu1 %vm103_vm1, %v97_v9 }
 0x132   :  { %v173_v16 = vpop.f32.mrb[0].mxu1 }
 0x133   :  { %v391_v17 = vpop.f32.mrb[1].mxu1 }
 0x136   :  { %v246_v18 = vpop.f32.mrb[2].mxu1 }
 0x137   :  { %v247_v20 = vadd.f32 %v246_v18, %v173_v16  ;;  %v398_v21 = vpop.f32.mrb[3].mxu1 }
 0x139   :  { %v257_v22 = vadd.f32 %v370_v19, %v247_v20 }
 0x13b   :  { %v258_v23 = vmax.f32 %v257_v22, 0.0 }
 0x13d   :  { %408 = vmatmul.mubr.msk.f32.vlgmr.msra.gmra.mrb[0].mxu0 %vm270_vm2, %v258_v23 }
 0x210   :  { %v340_v25 = vpop.f32.mrb[0].mxu0 }
 0x211   :  { %v341_v26 = vadd.f32 %v371_v24, %v340_v25  ;;  %v409_v27 = vpop.f32.mrb[1].mxu0 }
 0x213   :  { %v344_v29 = vmax.f32 %v341_v26, 0.0 }
 0x215   :  { %v352_v30 = vmul.f32 %v373_v28, %v344_v29 }
 0x217   :  { %v353_v31 = vsel %vm270_vm2, %v352_v30, 0.0 }
 0x218   :  { %354 = vadd.xlane.f32.xlu0 %v353_v31 }
 0x2a5   :  { %v355_v33 = vpop.xlane.xlu0 %354 }
 0x2a6   :  { %v358_v34 = vadd.f32 %v357_v32, %v355_v33 }
 0x2a8   :  { %360 = vst.msk [vmem:[%s704_s9] sm:$0xff] %vm359_vm3, %v358_v34 }
 0x2a9   :  { %365 = vsyncpa [#allocation4], 1 }
 0x2aa   :  { %366 = vsyncpa [#allocation6], 1 }
 0x2ab   :  { %367 = vsyncpa [#allocation9], 1 }

</bundles_post_ra>
